<compile_context>
chip_gen: v7x
topology: tpu7x:2x2x1
jax: 0.10.0
libtpu: 0.0.40
codegen_flags: <defaults>
</compile_context>

<pallas_src>
import functools

import jax
import jax.numpy as jnp
import numpy as np
from jax.experimental import pallas as pl
from jax.experimental.pallas import tpu as pltpu

_LANE = 128
_SUBLANE = 8


def _pick_g(H, W, s):
    """Smallest g dividing H with L = s*s*g*W a multiple of 128 (lane-dense
    stores + minimal dot width).  Falls back to 1 (correct, masked stores)."""
    for g in range(1, H + 1):
        if H % g == 0 and (s * s * g * W) % _LANE == 0:
            return g
    return 1


def _pick_row_tile(R, row_bytes, target_bytes=2 << 20, max_rows=1024):
    """Largest divisor of R that keeps one (in+out) step tile under
    target_bytes, is <= max_rows and a multiple of 8 (or == R)."""
    cap = min(max_rows, max(_SUBLANE, target_bytes // max(row_bytes, 1)))
    if R <= cap:
        return R
    divs = [d for d in range(_SUBLANE, cap + 1)
            if R % d == 0 and d % _SUBLANE == 0]
    return divs[-1] if divs else R


def _build_perm(s, g, W, planes):
    """Constant 0/1 permutation blocks P[i*s+j] : (planes*g*W, s*s*g*W).

    Input lane of channel block (i, j) is (h', w); its output lane is
    ((h'*s + i)*W + w)*s + j.  For planes > 1 (f32 split) the block is tiled
    vertically so hi/mid/lo share one fused MXU pass."""
    gW = g * W
    L = s * s * gW
    P = np.zeros((s * s, gW, L), np.float32)
    for i in range(s):
        for j in range(s):
            for hp in range(g):
                for w in range(W):
                    m = hp * W + w
                    n = ((hp * s + i) * W + w) * s + j
                    P[i * s + j, m, n] = 1.0
    if planes > 1:
        P = np.concatenate([P] * planes, axis=1)       # (s*s, planes*gW, L)
    return P


def _expand_kernel(x_ref, p_ref, o_ref, *, s, split):
    # x_ref: (1, s*s, Rt, gW)          rows = (k, h_block), lanes = (h', w)
    # p_ref: (s*s, planes*gW, L) bf16  constant permutation blocks (resident)
    # o_ref: (1, Rt, L)                rows = (k, h_block), lanes = (h', i, w, j)
    acc = None
    for ij in range(s * s):                     # static unroll, s*s == 4
        a = x_ref[0, ij]                        # (Rt, gW)
        if split:
            # Exact 3-way bf16 split of f32 (8+8+8 mantissa bits), fused into
            # ONE MXU pass per (i, j) block via lane concatenation.
            # TODO(synk): +-inf / NaN / deep-subnormal f32 values are not
            # bit-preserved by this MXU split path (finite normal values are).
            hi = a.astype(jnp.bfloat16)
            r1 = a - hi.astype(jnp.float32)
            mid = r1.astype(jnp.bfloat16)
            lo = (r1 - mid.astype(jnp.float32)).astype(jnp.bfloat16)
            lhs = jnp.concatenate([hi, mid, lo], axis=-1)   # (Rt, 3*gW) bf16
        else:
            lhs = a                                          # bf16 input, exact
        part = jnp.dot(lhs, p_ref[ij], preferred_element_type=jnp.float32)
        acc = part if acc is None else acc + part            # disjoint columns
    o_ref[0] = acc.astype(o_ref.dtype)


@functools.partial(jax.jit, static_argnames=("gain",))
def expand_forward(x, gain=2):
    B, C, H, W = x.shape
    s = gain
    if C % (s * s) != 0:
        raise ValueError("channels must be divisible by gain**2")
    if x.dtype not in (jnp.float32, jnp.bfloat16):
        # TODO(synk): integer / fp16 inputs would need a non-MXU copy path.
        raise NotImplementedError("expand_forward supports float32 / bfloat16")

    split = x.dtype == jnp.float32
    planes = 3 if split else 1
    Cp = C // (s * s)
    g = _pick_g(H, W, s)
    Hg = H // g
    gW = g * W
    L = s * s * gW                      # output lane width per row
    R = Cp * Hg                         # rows per batch element

    itemsize = x.dtype.itemsize
    # lane-padded VMEM footprint of one row (input tile + output tile)
    in_row = s * s * (pl.cdiv(gW, _LANE) * _LANE) * itemsize
    out_row = (pl.cdiv(L, _LANE) * _LANE) * itemsize
    Rt = _pick_row_tile(R, in_row + out_row)

    # Free contiguous reshape: (B, C, H, W) -> (B, s*s, R, g*W).
    xv = x.reshape(B, s * s, R, gW)
    p = jnp.asarray(_build_perm(s, g, W, planes), jnp.bfloat16)

    bytes_accessed = int(x.size * itemsize * 2 + p.size * 2)
    out = pl.pallas_call(
        functools.partial(_expand_kernel, s=s, split=split),
        out_shape=jax.ShapeDtypeStruct((B, R, L), x.dtype),
        grid=(B, R // Rt),
        in_specs=[
            pl.BlockSpec((1, s * s, Rt, gW), lambda b, r: (b, 0, r, 0)),
            # grid-invariant block: DMA'd once, stays resident in VMEM
            pl.BlockSpec((s * s, planes * gW, L), lambda b, r: (0, 0, 0)),
        ],
        out_specs=pl.BlockSpec((1, Rt, L), lambda b, r: (b, r, 0)),
        compiler_params=pltpu.CompilerParams(
            dimension_semantics=("parallel", "parallel"),
            vmem_limit_bytes=32 * 1024 * 1024),
        cost_estimate=pl.CostEstimate(
            flops=0, transcendentals=0, bytes_accessed=bytes_accessed),
    )(xv, p)

    # Free contiguous reshape back to the NCHW output layout.
    return out.reshape(B, Cp, H * s, W * s)


# -------------------- pure-JAX reference (mirrors the PyTorch forward) -------

def expand_ref(x, gain=2):
    b, c, h, w = x.shape
    s = gain
    y = x.reshape(b, s, s, c // (s * s), h, w)
    y = jnp.transpose(y, (0, 3, 4, 1, 5, 2))
    return y.reshape(b, c // (s * s), h * s, w * s)


# -------------------- main --------------------

if __name__ == "__main__":
    key = jax.random.PRNGKey(0)
    x = jax.random.normal(key, (2, 8, 16, 16), jnp.float32)   # (B, C, H, W)

    out = jax.block_until_ready(expand_forward(x, gain=2))
    ref = expand_ref(x, gain=2)

    assert out.shape == ref.shape == (2, 2, 32, 32)
    np.testing.assert_allclose(np.asarray(out), np.asarray(ref),
                               rtol=1e-6, atol=1e-6)
    print("KERNEL_OK")
</pallas_src>

<mosaic_0001>
module attributes {stable_mosaic.version = 11 : i64} {
  func.func @_expand_kernel(%arg0: i32, %arg1: i32, %arg2: memref<1x4x16x32xf32, #tpu.memory_space<vmem>>, %arg3: memref<4x96x128xbf16, #tpu.memory_space<vmem>>, %arg4: memref<1x16x128xf32, #tpu.memory_space<vmem>>) attributes {dimension_semantics = [#tpu.dimension_semantics<parallel>, #tpu.dimension_semantics<parallel>], iteration_bounds = array<i64: 2, 1>, scalar_prefetch = 0 : i64, scratch_operands = 0 : i64, tpu.core_type = #tpu.core_type<tc>, window_params = [{transform_indices = @transform_0, window_bounds = array<i64: 1, 4, 16, 32>}, {pipeline_mode = #tpu.pipeline_mode<synchronous>, transform_indices = @transform_1, window_bounds = array<i64: 4, 96, 128>}, {transform_indices = @transform_2, window_bounds = array<i64: 1, 16, 128>}]} {
    %c0 = arith.constant 0 : index
    %c0_0 = arith.constant 0 : index
    %c0_1 = arith.constant 0 : index
    %c0_2 = arith.constant 0 : index
    %0 = vector.load %arg2[%c0, %c0_0, %c0_1, %c0_2] : memref<1x4x16x32xf32, #tpu.memory_space<vmem>>, vector<1x1x16x32xf32>
    %1 = vector.shape_cast %0 : vector<1x1x16x32xf32> to vector<16x32xf32>
    %2 = arith.truncf %1 : vector<16x32xf32> to vector<16x32xbf16>
    %3 = arith.extf %2 : vector<16x32xbf16> to vector<16x32xf32>
    %4 = arith.subf %1, %3 : vector<16x32xf32>
    %5 = arith.truncf %4 : vector<16x32xf32> to vector<16x32xbf16>
    %6 = arith.extf %5 : vector<16x32xbf16> to vector<16x32xf32>
    %7 = arith.subf %4, %6 : vector<16x32xf32>
    %8 = arith.truncf %7 : vector<16x32xf32> to vector<16x32xbf16>
    %9 = tpu.concatenate %2, %5, %8 in 1 : vector<16x32xbf16>, vector<16x32xbf16>, vector<16x32xbf16> -> vector<16x96xbf16>
    %c0_3 = arith.constant 0 : index
    %c0_4 = arith.constant 0 : index
    %c0_5 = arith.constant 0 : index
    %10 = vector.load %arg3[%c0_3, %c0_4, %c0_5] : memref<4x96x128xbf16, #tpu.memory_space<vmem>>, vector<1x96x128xbf16>
    %11 = vector.shape_cast %10 : vector<1x96x128xbf16> to vector<96x128xbf16>
    %cst = arith.constant dense<0.000000e+00> : vector<16x128xf32>
    %12 = tpu.matmul %9, %11, %cst {dimension_numbers = #tpu.dot_dimension_numbers<[1], [0], [0], [1], [0, 0, 1, 1], [], []>} : vector<16x96xbf16>, vector<96x128xbf16>, vector<16x128xf32> -> vector<16x128xf32>
    %c0_6 = arith.constant 0 : index
    %c1 = arith.constant 1 : index
    %c0_7 = arith.constant 0 : index
    %c0_8 = arith.constant 0 : index
    %13 = vector.load %arg2[%c0_6, %c1, %c0_7, %c0_8] : memref<1x4x16x32xf32, #tpu.memory_space<vmem>>, vector<1x1x16x32xf32>
    %14 = vector.shape_cast %13 : vector<1x1x16x32xf32> to vector<16x32xf32>
    %15 = arith.truncf %14 : vector<16x32xf32> to vector<16x32xbf16>
    %16 = arith.extf %15 : vector<16x32xbf16> to vector<16x32xf32>
    %17 = arith.subf %14, %16 : vector<16x32xf32>
    %18 = arith.truncf %17 : vector<16x32xf32> to vector<16x32xbf16>
    %19 = arith.extf %18 : vector<16x32xbf16> to vector<16x32xf32>
    %20 = arith.subf %17, %19 : vector<16x32xf32>
    %21 = arith.truncf %20 : vector<16x32xf32> to vector<16x32xbf16>
    %22 = tpu.concatenate %15, %18, %21 in 1 : vector<16x32xbf16>, vector<16x32xbf16>, vector<16x32xbf16> -> vector<16x96xbf16>
    %c1_9 = arith.constant 1 : index
    %c0_10 = arith.constant 0 : index
    %c0_11 = arith.constant 0 : index
    %23 = vector.load %arg3[%c1_9, %c0_10, %c0_11] : memref<4x96x128xbf16, #tpu.memory_space<vmem>>, vector<1x96x128xbf16>
    %24 = vector.shape_cast %23 : vector<1x96x128xbf16> to vector<96x128xbf16>
    %cst_12 = arith.constant dense<0.000000e+00> : vector<16x128xf32>
    %25 = tpu.matmul %22, %24, %cst_12 {dimension_numbers = #tpu.dot_dimension_numbers<[1], [0], [0], [1], [0, 0, 1, 1], [], []>} : vector<16x96xbf16>, vector<96x128xbf16>, vector<16x128xf32> -> vector<16x128xf32>
    %26 = arith.addf %12, %25 : vector<16x128xf32>
    %c0_13 = arith.constant 0 : index
    %c2 = arith.constant 2 : index
    %c0_14 = arith.constant 0 : index
    %c0_15 = arith.constant 0 : index
    %27 = vector.load %arg2[%c0_13, %c2, %c0_14, %c0_15] : memref<1x4x16x32xf32, #tpu.memory_space<vmem>>, vector<1x1x16x32xf32>
    %28 = vector.shape_cast %27 : vector<1x1x16x32xf32> to vector<16x32xf32>
    %29 = arith.truncf %28 : vector<16x32xf32> to vector<16x32xbf16>
    %30 = arith.extf %29 : vector<16x32xbf16> to vector<16x32xf32>
    %31 = arith.subf %28, %30 : vector<16x32xf32>
    %32 = arith.truncf %31 : vector<16x32xf32> to vector<16x32xbf16>
    %33 = arith.extf %32 : vector<16x32xbf16> to vector<16x32xf32>
    %34 = arith.subf %31, %33 : vector<16x32xf32>
    %35 = arith.truncf %34 : vector<16x32xf32> to vector<16x32xbf16>
    %36 = tpu.concatenate %29, %32, %35 in 1 : vector<16x32xbf16>, vector<16x32xbf16>, vector<16x32xbf16> -> vector<16x96xbf16>
    %c2_16 = arith.constant 2 : index
    %c0_17 = arith.constant 0 : index
    %c0_18 = arith.constant 0 : index
    %37 = vector.load %arg3[%c2_16, %c0_17, %c0_18] : memref<4x96x128xbf16, #tpu.memory_space<vmem>>, vector<1x96x128xbf16>
    %38 = vector.shape_cast %37 : vector<1x96x128xbf16> to vector<96x128xbf16>
    %cst_19 = arith.constant dense<0.000000e+00> : vector<16x128xf32>
    %39 = tpu.matmul %36, %38, %cst_19 {dimension_numbers = #tpu.dot_dimension_numbers<[1], [0], [0], [1], [0, 0, 1, 1], [], []>} : vector<16x96xbf16>, vector<96x128xbf16>, vector<16x128xf32> -> vector<16x128xf32>
    %40 = arith.addf %26, %39 : vector<16x128xf32>
    %c0_20 = arith.constant 0 : index
    %c3 = arith.constant 3 : index
    %c0_21 = arith.constant 0 : index
    %c0_22 = arith.constant 0 : index
    %41 = vector.load %arg2[%c0_20, %c3, %c0_21, %c0_22] : memref<1x4x16x32xf32, #tpu.memory_space<vmem>>, vector<1x1x16x32xf32>
    %42 = vector.shape_cast %41 : vector<1x1x16x32xf32> to vector<16x32xf32>
    %43 = arith.truncf %42 : vector<16x32xf32> to vector<16x32xbf16>
    %44 = arith.extf %43 : vector<16x32xbf16> to vector<16x32xf32>
    %45 = arith.subf %42, %44 : vector<16x32xf32>
    %46 = arith.truncf %45 : vector<16x32xf32> to vector<16x32xbf16>
    %47 = arith.extf %46 : vector<16x32xbf16> to vector<16x32xf32>
    %48 = arith.subf %45, %47 : vector<16x32xf32>
    %49 = arith.truncf %48 : vector<16x32xf32> to vector<16x32xbf16>
    %50 = tpu.concatenate %43, %46, %49 in 1 : vector<16x32xbf16>, vector<16x32xbf16>, vector<16x32xbf16> -> vector<16x96xbf16>
    %c3_23 = arith.constant 3 : index
    %c0_24 = arith.constant 0 : index
    %c0_25 = arith.constant 0 : index
    %51 = vector.load %arg3[%c3_23, %c0_24, %c0_25] : memref<4x96x128xbf16, #tpu.memory_space<vmem>>, vector<1x96x128xbf16>
    %52 = vector.shape_cast %51 : vector<1x96x128xbf16> to vector<96x128xbf16>
    %cst_26 = arith.constant dense<0.000000e+00> : vector<16x128xf32>
    %53 = tpu.matmul %50, %52, %cst_26 {dimension_numbers = #tpu.dot_dimension_numbers<[1], [0], [0], [1], [0, 0, 1, 1], [], []>} : vector<16x96xbf16>, vector<96x128xbf16>, vector<16x128xf32> -> vector<16x128xf32>
    %54 = arith.addf %40, %53 : vector<16x128xf32>
    %c0_27 = arith.constant 0 : index
    %c0_28 = arith.constant 0 : index
    %c0_29 = arith.constant 0 : index
    %55 = vector.load %arg4[%c0_27, %c0_28, %c0_29] : memref<1x16x128xf32, #tpu.memory_space<vmem>>, vector<1x16x128xf32>
    %56 = vector.shape_cast %55 : vector<1x16x128xf32> to vector<16x128xf32>
    %57 = vector.shape_cast %54 : vector<16x128xf32> to vector<1x16x128xf32>
    tpu.vector_store %arg4[%c0_27, %c0_28, %c0_29], %57 {strides = array<i32>} : memref<1x16x128xf32, #tpu.memory_space<vmem>>, vector<1x16x128xf32>,
    return
  }
  func.func @transform_0(%arg0: i32, %arg1: i32) -> (i32, i32, i32, i32) {
    %c0_i32 = arith.constant 0 : i32
    %c0_i32_0 = arith.constant 0 : i32
    %c0_i32_1 = arith.constant 0 : i32
    return %arg0, %c0_i32, %arg1, %c0_i32_0 : i32, i32, i32, i32
  }
  func.func @transform_1(%arg0: i32, %arg1: i32) -> (i32, i32, i32) {
    %c0_i32 = arith.constant 0 : i32
    %c0_i32_0 = arith.constant 0 : i32
    %c0_i32_1 = arith.constant 0 : i32
    %c0_i32_2 = arith.constant 0 : i32
    return %c0_i32, %c0_i32_0, %c0_i32_1 : i32, i32, i32
  }
  func.func @transform_2(%arg0: i32, %arg1: i32) -> (i32, i32, i32) {
    %c0_i32 = arith.constant 0 : i32
    %c0_i32_0 = arith.constant 0 : i32
    return %arg0, %arg1, %c0_i32 : i32, i32, i32
  }
}

</mosaic_0001>

<bundles_post_ra>
// kernel: expand_forward.1
= control target key start
LH: loop header
LB: loop body
LE: loop exit
PB: predicated region body
PF: predicated region fallthrough
CT: control target
= control target key end

     0   :  { %s1026_s9 = smov 0   ;;  %s1028_s10 = smov 0   ;;  %s1203_s0 = inlined_call_operand.vmem [shape: f32[2,4,16,32], index: 0, kind: input, shape index: {}]   ;;  %s1204_s1 = inlined_call_operand.vmem [shape: bf16[4,96,128], index: 1, kind: input, shape index: {}]   ;;  %s1205_s2 = inlined_call_operand.vmem [shape: f32[2,16,128], index: 2, kind: output, shape index: {}]  }
   0x1   :  { %s1030_s11 = smov 0  }
   0x2 LB: > { %s24_s12 = sadd.s32 1, %s1001_s10  ;;  %p750_p0 = scmp.ge.s32.totalorder %s1005_s11, 1  ;;  %s1005_s11 = sphi %s1030_s11, %s12_s11   ;;  %s1001_s10 = sphi %s1028_s10, %s1207_s10   ;;  %s997_s9 = sphi %s1026_s9, %s1206_s9  }
   0x3   : > { %p26_p1 = scmp.ge.s32.totalorder %s24_s12, 2  ;;  %p133_p2 = scmp.lt.s32.totalorder %s1005_s11, 3 }
   0x5   : > { %s1209_s12 = smov (%p26_p1, %s24_s12), 0  ;;  %p134_p3 = pnand %p750_p0, %p133_p2 }
   0x6   : > { %p164_p4 = scmp.lt.s32.totalorder (!%p134_p3), %s997_s9, 1  ;;  %v959_v0 = vld [vmem:[%s1204_s1 + $0x30] sm:$0xff] (!%p134_p3)   ;;  %v1007_v1 = vmov (!%p134_p3), 0.0   ;;  %v960_v2 = vld [vmem:[%s1204_s1 + $0x38] sm:$0xff] (!%p134_p3)   ;;  %v961_v3 = vld [vmem:[%s1204_s1 + $0x60] sm:$0xff] (!%p134_p3)   ;;  %vm1008_vm0 = vmmov (!%p134_p3), 0  }
   0x7   : > { %137 = sbr.rel (%p134_p3) target bundleno = 393 (0x189), region = 28  ;;  %857 = vmatprep.subr.bf16.mxu1 (!%p134_p3), %v1007_v1  ;;  %889 = vmatprep.subr.bf16.mxu0 (!%p134_p3), %v1007_v1  ;;  %v962_v4 = vld [vmem:[%s1204_s1 + $0x40] sm:$0xff] (!%p134_p3)   ;;  %v963_v5 = vld [vmem:[%s1204_s1 + $0x68] sm:$0xff] (!%p134_p3)   ;;  %v965_v20 = vld [vmem:[%s1204_s1 + $0x70] sm:$0xff] (!%p134_p3)   ;;  %s1009_s7 = smov (!%p134_p3), 32   ;;  %vm203_vm1 = vcmask (!%p134_p3), 261120  }
   0x8   : > { %858 = vmatpush3.bf16.msra.mxu1 (!%p134_p3), %v959_v0  ;;  %890 = vmatpush3.bf16.msra.mxu0 (!%p134_p3), %v961_v3  ;;  %v964_v25 = vld [vmem:[%s1204_s1 + $0x48] sm:$0xff] (!%p134_p3)   ;;  %v967_v34 = vld [vmem:[%s1204_s1 + $0x78] sm:$0xff] (!%p134_p3)   ;;  %v966_v40 = vld [vmem:[%s1204_s1 + $0x50] sm:$0xff] (!%p134_p3)   ;;  %s1010_s18 = smov (!%p134_p3), 64   ;;  %vm207_vm2 = vcmask (!%p134_p3), 523264   ;;  %vm296_vm3 = vcmask (!%p134_p3), 785408  }
   0x9   : > { %859 = vmatprep.subr.bf16.mxu1 (!%p134_p3), %v1007_v1  ;;  %891 = vmatprep.subr.bf16.mxu0 (!%p134_p3), %v1007_v1  ;;  %v969_v47 = vld [vmem:[%s1204_s1 + $0x80] sm:$0xff] (!%p134_p3)   ;;  %v968_v53 = vld [vmem:[%s1204_s1 + $0x58] sm:$0xff] (!%p134_p3)   ;;  %v971_v57 = vld [vmem:[%s1204_s1 + $0x88] sm:$0xff] (!%p134_p3)  }
   0xa   : > { %869 = vmatprep.mubr.msk.bf16.mxu1 (!%p134_p3), %vm1008_vm0, %v1007_v1  ;;  %901 = vmatprep.mubr.msk.bf16.mxu0 (!%p134_p3), %vm1008_vm0, %v1007_v1 }
   0xc   : > { %860 = vmatpush3.bf16.msra.mxu1 (!%p134_p3), %v960_v2  ;;  %892 = vmatpush3.bf16.msra.mxu0 (!%p134_p3), %v963_v5 }
   0xd   : > { %861 = vmatprep.subr.bf16.mxu1 (!%p134_p3), %v1007_v1  ;;  %893 = vmatprep.subr.bf16.mxu0 (!%p134_p3), %v1007_v1 }
   0xe   : > { %s1211_s9 = smov (!%p164_p4, %s997_s9), 1 }
   0xf   : > { %s827_s19 = sshll.u32 %s1211_s9, 6 }
  0x10   : > { %s171_s24 = scalar_lea.vmem %s1203_s0, %s827_s19  ;;  %862 = vmatpush3.bf16.msra.mxu1 %v962_v4  ;;  %894 = vmatpush3.bf16.msra.mxu0 %v965_v20  ;;  %v970_v4 = vld [vmem:[%s1204_s1] sm:$0xff]   ;;  %s828_s19 = sshll.u32 %s1211_s9, 4 }
  0x11   : > { %v755_v6 = vld [vmem:[%s171_s24 + $0x10] sm:$0xff]  ;;  %v756_v7 = vld [vmem:[%s171_s24 + $0x18] sm:$0xff]  ;;  %v783_v8 = vld [vmem:[%s171_s24 + $0x20] sm:$0xff]  ;;  %863 = vmatprep.subr.bf16.mxu1 %v1007_v1  ;;  %895 = vmatprep.subr.bf16.mxu0 %v1007_v1  ;;  %s181_s22 = scalar_lea.vmem %s1205_s2, %s828_s19 }
  0x12   : > { %v1069_v9 = vpack.c.bf16 %v756_v7, %v755_v6  ;;  %v784_v10 = vld [vmem:[%s171_s24 + $0x28] sm:$0xff]  ;;  %v184_v11 = vld [vmem:[%s171_s24] sm:$0xff]  ;;  %v804_v15 = vld [vmem:[%s171_s24 + $0x30] sm:$0xff] }
  0x13   : > { %v185_v12 = vld [vmem:[%s171_s24 + $0x8] sm:$0xff]  ;;  %v1072_v13 = vpack.c.bf16 %v784_v10, %v783_v8  ;;  %v805_v16 = vld [vmem:[%s171_s24 + $0x38] sm:$0xff]  ;;  %v978_v20 = vld [vmem:[%s1204_s1 + $0x20] sm:$0xff]  }
  0x14   : > { %v1074_v14 = vpack.c.bf16 %v185_v12, %v184_v11  ;;  %v226_v17 = vunpack.c.l.bf16 %v1069_v9  ;;  %v227_v18 = vunpack.c.h.bf16 %v1069_v9  ;;  %v1080_v19 = vpack.c.bf16 %v805_v16, %v804_v15  ;;  %864 = vmatpush3.bf16.msra.mxu1 %v964_v25  ;;  %896 = vmatpush3.bf16.msra.mxu0 %v967_v34 }
  0x15   : > { %v423_v21 = vunpack.c.l.bf16 %v1072_v13  ;;  %v424_v22 = vunpack.c.h.bf16 %v1072_v13  ;;  %865 = vmatprep.subr.bf16.mxu1 %v1007_v1  ;;  %897 = vmatprep.subr.bf16.mxu0 %v1007_v1 }
  0x16   : > { %v187_v23 = vunpack.c.l.bf16 %v1074_v14  ;;  %v188_v24 = vunpack.c.h.bf16 %v1074_v14  ;;  %v228_v26 = vsub.f32 %v755_v6, %v226_v17  ;;  %v229_v27 = vsub.f32 %v756_v7, %v227_v18  ;;  %v977_v17 = vld [vmem:[%s1204_s1 + $0xa0] sm:$0xff]  }
  0x17   : > { %v542_v28 = vunpack.c.l.bf16 %v1080_v19  ;;  %v543_v29 = vunpack.c.h.bf16 %v1080_v19  ;;  %v425_v30 = vsub.f32 %v783_v8, %v423_v21  ;;  %v426_v31 = vsub.f32 %v784_v10, %v424_v22  ;;  %v973_v10 = vld [vmem:[%s1204_s1 + $0x90] sm:$0xff]   ;;  %v979_v21 = vld [vmem:[%s1204_s1 + $0xa8] sm:$0xff]  }
  0x18   : > { %v189_v32 = vsub.f32 %v184_v11, %v187_v23  ;;  %v190_v33 = vsub.f32 %v185_v12, %v188_v24  ;;  %v230_v35 = vpack.c.bf16 %v229_v27, %v228_v26  ;;  %866 = vmatpush3.bf16.msra.mxu1 %v966_v40  ;;  %898 = vmatpush3.bf16.msra.mxu0 %v969_v47  ;;  %v980_v22 = vld [vmem:[%s1204_s1 + $0x28] sm:$0xff]   ;;  %v981_v23 = vld [vmem:[%s1204_s1 + $0xb0] sm:$0xff]  }
  0x19   : > { %v544_v36 = vsub.f32 %v804_v15, %v542_v28  ;;  %v545_v37 = vsub.f32 %v805_v16, %v543_v29  ;;  %v427_v38 = vpack.c.bf16 %v426_v31, %v425_v30  ;;  %867 = vmatprep.subr.bf16.mxu1 %v1007_v1  ;;  %899 = vmatprep.subr.bf16.mxu0 %v1007_v1  ;;  %v975_v15 = vld [vmem:[%s1204_s1 + $0x98] sm:$0xff]  }
  0x1a   : > { %v191_v39 = vpack.c.bf16 %v190_v33, %v189_v32  ;;  %237 = vrot.lane.b32.xlu0 %v230_v35, %s1009_s7  ;;  %v231_v41 = vunpack.c.l.bf16 %v230_v35  ;;  %v232_v42 = vunpack.c.h.bf16 %v230_v35  ;;  %v976_v16 = vld [vmem:[%s1204_s1 + $0x18] sm:$0xff]  }
  0x1b   : > { %v428_v43 = vunpack.c.l.bf16 %v427_v38  ;;  %v429_v44 = vunpack.c.h.bf16 %v427_v38  ;;  %v546_v50 = vpack.c.bf16 %v545_v37, %v544_v36  ;;  %v982_v28 = vld [vmem:[%s1204_s1 + $0xb8] sm:$0xff]  }
  0x1c   : > { %v192_v45 = vunpack.c.l.bf16 %v191_v39  ;;  %v193_v46 = vunpack.c.h.bf16 %v191_v39  ;;  %v233_v48 = vsub.f32 %v228_v26, %v231_v41  ;;  %v234_v49 = vsub.f32 %v229_v27, %v232_v42  ;;  %868 = vmatpush3.bf16.msra.mxu1 %v968_v53  ;;  %900 = vmatpush3.bf16.msra.mxu0 %v971_v57 }
  0x1d   : > { %v430_v51 = vsub.f32 %v425_v30, %v428_v43  ;;  %v431_v52 = vsub.f32 %v426_v31, %v429_v44  ;;  %v547_v59 = vunpack.c.l.bf16 %v546_v50  ;;  %v548_v60 = vunpack.c.h.bf16 %v546_v50  ;;  %873 = vmatprep.subr.bf16.mxu1 %v1007_v1  ;;  %905 = vmatprep.subr.bf16.mxu0 %v1007_v1 }
  0x1e   : > { %v235_v54 = vpack.c.bf16 %v234_v49, %v233_v48  ;;  %434 = vrot.lane.b32.xlu0 %v427_v38, %s1009_s7  ;;  %v194_v55 = vsub.f32 %v189_v32, %v192_v45  ;;  %v195_v56 = vsub.f32 %v190_v33, %v193_v46 }
  0x1f   : > { %v432_v58 = vpack.c.bf16 %v431_v52, %v430_v51  ;;  %v549_v62 = vsub.f32 %v544_v36, %v547_v59  ;;  %v550_v63 = vsub.f32 %v545_v37, %v548_v60 }
  0x20   : > { %240 = vrot.lane.b32.xlu1 %v235_v54, %s1010_s18  ;;  %v196_v61 = vpack.c.bf16 %v195_v56, %v194_v55 }
  0x21   : > { %v551_v0 = vpack.c.bf16 %v550_v63, %v549_v62 }
  0x22   : > { %198 = vrot.lane.b32.xlu0 %v191_v39, %s1009_s7 }
  0x24   : > { %437 = vrot.lane.b32.xlu1 %v432_v58, %s1010_s18 }
  0x26   : > { %201 = vrot.lane.b32.xlu0 %v196_v61, %s1010_s18 }
  0x28   : > { %553 = vrot.lane.b32.xlu1 %v546_v50, %s1009_s7 }
  0x2c   : > { %556 = vrot.lane.b32.xlu1 %v551_v0, %s1010_s18 }
  0x8c   : > { %v238_v2 = vpop.permute.xlu0 %237 }
  0x8d   : > { %v244_v3 = vsel %vm203_vm1, %v1069_v9, %v238_v2  ;;  %v972_v9 = vld [vmem:[%s1204_s1 + $0x8] sm:$0xff]  }
  0x90   : > { %v435_v5 = vpop.permute.xlu0 %434 }
  0x91   : > { %v441_v8 = vsel %vm203_vm1, %v1072_v13, %v435_v5  ;;  %v974_v13 = vld [vmem:[%s1204_s1 + $0x10] sm:$0xff]  }
  0x92   : > { %v241_v6 = vpop.permute.xlu1 %240 }
  0x93   : > { %v246_v7 = vsel %vm207_vm2, %v244_v3, %v241_v6 }
  0x94   : > { %870 = vmatmul.mubr.msk.bf16.vlgmr.msra.gmra.mrb[0].mxu1 %vm296_vm3, %v246_v7  ;;  %v199_v18 = vpop.permute.xlu0 %198 }
  0x95   : > { %874 = vmatpush3.bf16.msra.mxu1 %v970_v4  ;;  %885 = vmatprep.mubr.msk.bf16.mxu1 %vm1008_vm0, %v1007_v1  ;;  %v206_v24 = vsel %vm203_vm1, %v1074_v14, %v199_v18 }
  0x96   : > { %v438_v11 = vpop.permute.xlu1 %437  ;;  %875 = vmatprep.subr.bf16.mxu1 %v1007_v1 }
  0x97   : > { %v443_v12 = vsel %vm207_vm2, %v441_v8, %v438_v11 }
  0x98   : > { %902 = vmatmul.mubr.msk.bf16.vlgmr.msra.gmra.mrb[0].mxu0 %vm296_vm3, %v443_v12  ;;  %v202_v26 = vpop.permute.xlu0 %201 }
  0x99   : > { %876 = vmatpush3.bf16.msra.mxu1 %v972_v9  ;;  %906 = vmatpush3.bf16.msra.mxu0 %v973_v10  ;;  %v209_v27 = vsel %vm207_vm2, %v206_v24, %v202_v26 }
  0x9a   : > { %877 = vmatprep.subr.bf16.mxu1 %v1007_v1  ;;  %907 = vmatprep.subr.bf16.mxu0 %v1007_v1  ;;  %v554_v25 = vpop.permute.xlu1 %553 }
  0x9b   : > { %917 = vmatprep.mubr.msk.bf16.mxu0 %vm1008_vm0, %v1007_v1  ;;  %v560_v14 = vsel %vm203_vm1, %v1080_v19, %v554_v25 }
  0x9d   : > { %878 = vmatpush3.bf16.msra.mxu1 %v974_v13  ;;  %908 = vmatpush3.bf16.msra.mxu0 %v975_v15 }
  0x9e   : > { %879 = vmatprep.subr.bf16.mxu1 %v1007_v1  ;;  %909 = vmatprep.subr.bf16.mxu0 %v1007_v1  ;;  %v557_v29 = vpop.permute.xlu1 %556 }
  0x9f   : > { %v562_v30 = vsel %vm207_vm2, %v560_v14, %v557_v29 }
  0xa1   : > { %880 = vmatpush3.bf16.msra.mxu1 %v976_v16  ;;  %910 = vmatpush3.bf16.msra.mxu0 %v977_v17 }
  0xa2   : > { %881 = vmatprep.subr.bf16.mxu1 %v1007_v1  ;;  %911 = vmatprep.subr.bf16.mxu0 %v1007_v1 }
  0xa5   : > { %882 = vmatpush3.bf16.msra.mxu1 %v978_v20  ;;  %912 = vmatpush3.bf16.msra.mxu0 %v979_v21 }
  0xa6   : > { %883 = vmatprep.subr.bf16.mxu1 %v1007_v1  ;;  %913 = vmatprep.subr.bf16.mxu0 %v1007_v1 }
  0xa9   : > { %884 = vmatpush3.bf16.msra.mxu1 %v980_v22  ;;  %914 = vmatpush3.bf16.msra.mxu0 %v981_v23 }
  0xaa   : > { %915 = vmatprep.subr.bf16.mxu0 %v1007_v1 }
  0xac   : > { %886 = vmatmul.mubr.msk.bf16.vlgmr.msra.gmra.mrb[0].mxu1 %vm296_vm3, %v209_v27 }
  0xad   : > { %916 = vmatpush3.bf16.msra.mxu0 %v982_v28 }
  0xb0   : > { %918 = vmatmul.mubr.msk.bf16.vlgmr.msra.gmra.mrb[0].mxu0 %vm296_vm3, %v562_v30 }
 0x17f   : > { %v412_v31 = vpop.f32.mrb[0].mxu1 }
 0x180   : > { %v887_v32 = vpop.f32.mrb[1].mxu1 }
 0x181   : > { %v415_v33 = vpop.f32.mrb[2].mxu1 }
 0x182   : > { %v888_v34 = vpop.f32.mrb[3].mxu1 }
 0x183   : > { %v648_v1 = vpop.f32.mrb[0].mxu0 }
 0x184   : > { %v921_v35 = vadd.f32 %v648_v1, %v412_v31  ;;  %v919_v19 = vpop.f32.mrb[1].mxu0 }
 0x185   : > { %v651_v36 = vpop.f32.mrb[2].mxu0 }
 0x186   : > { %657 = vst [vmem:[%s181_s22] sm:$0xff] %v921_v35  ;;  %v922_v37 = vadd.f32 %v651_v36, %v415_v33  ;;  %v920_v38 = vpop.f32.mrb[3].mxu0 }
 0x188   : > { %658 = vst [vmem:[%s181_s22 + $0x8] sm:$0xff] %v922_v37 }
 0x189 PF: > { %s12_s11 = sadd.s32 1, %s1005_s11   ;;  %s1206_s9 = smov %s1001_s10 }
 0x18a   : > { %p9_p5 = scmp.ge.s32.totalorder %s12_s11, 4   ;;  %s1207_s10 = smov %s1209_s12 }
 0x18c   :  { %11 = sbr.rel (!%p9_p5) target bundleno = 2 (0x2), region = 64 }

</bundles_post_ra>
